<compile_context>
chip_gen: v7x
topology: tpu7x:2x2x1
jax: 0.10.0
libtpu: 0.0.40
codegen_flags: <defaults>
</compile_context>

<pallas_src>
import functools

import jax
import jax.numpy as jnp
from jax import lax
from jax.experimental import pallas as pl
from jax.experimental.pallas import tpu as pltpu

SEQ = 512               # hidden / FFT length (LayerNorm(512), 257 rfft bins)
FREQ = SEQ // 2 + 1     # 257
EPS = 1e-12             # matches LayerNorm(512, eps=1e-12) in the module


def _round_up(x, m):
    return (x + m - 1) // m * m


def build_filter_matrix(complex_weight):
    """Fold rfft -> complex-mul -> irfft (ortho norm) into one real (512, 512)
    matrix.  Depends only on the weights: compute once per weight update and
    cache; do NOT rebuild per forward call.  Stored in bf16 for the MXU (the
    matmul stays fully hidden under the x/out HBM traffic on v5e/v6e/v7x)."""
    w = complex_weight[..., 0] + 1j * complex_weight[..., 1]          # (1, 257)
    eye = jnp.eye(SEQ, dtype=jnp.float32)
    m = jnp.fft.irfft(jnp.fft.rfft(eye, axis=1, norm="ortho") * w,
                      n=SEQ, axis=1, norm="ortho")                    # (512, 512)
    return m.astype(jnp.bfloat16)


def filter_layer_kernel(x_ref, m_ref, gamma_ref, beta_ref, o_ref):
    x_in = x_ref[...]                                                 # (TB, N)
    x = x_in.astype(jnp.float32)
    # Spectral filtering as one MXU matmul: bf16 operands, f32 accumulation.
    y = jnp.dot(x_in.astype(jnp.bfloat16), m_ref[...],
                preferred_element_type=jnp.float32)                   # (TB, N) f32
    # TODO(synk): nn.Dropout(0.2) is identity in eval mode; training-mode dropout not applied.
    # Two-pass LayerNorm stats (better numerics than E[y^2]-mean^2; the extra
    # VPU/XLU pass is free since the kernel is DMA-bound).
    inv_n = jnp.float32(1.0 / SEQ)
    mean = jnp.sum(y, axis=-1, keepdims=True) * inv_n
    yc = y - mean
    var = jnp.sum(yc * yc, axis=-1, keepdims=True) * inv_n
    inv_std = lax.rsqrt(var + EPS)                                    # EUP slot
    # LN + residual, no (TB, N) scale/shift temporaries.
    o = (yc * inv_std) * gamma_ref[...] + beta_ref[...] + x
    o_ref[...] = o.astype(o_ref.dtype)


@functools.partial(jax.jit, static_argnames=("block_b",))
def filter_layer(x, filt_matrix, gamma, beta, *, block_b=1024):
    """x: (B, 512) f32 or bf16; filt_matrix: (512, 512) bf16 (from
    build_filter_matrix); gamma/beta: (512,).  Output dtype follows x.dtype."""
    B, N = x.shape
    assert N == SEQ
    # Batch tile: as large as block_b allows (amortizes the ~0.35 us per-step
    # overhead), but clamped to ~B/2 (rounded to the 8-row sublane unit) so the
    # grid keeps >= 2 steps for v7x's two TensorCores.  No padding: Pallas
    # masks the partial last block, so garbage rows are never stored and
    # nothing extra is read/written in HBM.
    half = _round_up(-(-B // 2), 8)
    tb = min(block_b, max(8, half))
    grid = (pl.cdiv(B, tb),)
    gamma2 = gamma.reshape(1, N).astype(jnp.float32)
    beta2 = beta.reshape(1, N).astype(jnp.float32)
    # v5e's scoped-VMEM default is only 16 MiB; at tb >= 512 the double-buffered
    # f32 in/out tiles plus f32 temporaries need more, so raise it explicitly
    # (48 MiB fits comfortably under v7x's 64 MiB physical VMEM).
    vmem_limit = 48 * 1024 * 1024 if tb >= 512 else None

    return pl.pallas_call(
        filter_layer_kernel,
        out_shape=jax.ShapeDtypeStruct((B, N), x.dtype),
        grid=grid,
        in_specs=[pl.BlockSpec((tb, N), lambda i: (i, 0)),   # x: streamed per batch tile
                  pl.BlockSpec((N, N), lambda i: (0, 0)),    # M: VMEM-resident across steps
                  pl.BlockSpec((1, N), lambda i: (0, 0)),    # LayerNorm gamma
                  pl.BlockSpec((1, N), lambda i: (0, 0))],   # LayerNorm beta
        out_specs=pl.BlockSpec((tb, N), lambda i: (i, 0)),
        compiler_params=pltpu.CompilerParams(
            dimension_semantics=("parallel",),
            vmem_limit_bytes=vmem_limit),
    )(x, filt_matrix, gamma2, beta2)


def reference(x, complex_weight, gamma, beta):
    """Pure-JAX reference mirroring the PyTorch forward (eval mode)."""
    w = complex_weight[..., 0] + 1j * complex_weight[..., 1]
    X = jnp.fft.rfft(x, axis=1, norm="ortho") * w
    y = jnp.fft.irfft(X, n=x.shape[1], axis=1, norm="ortho")
    mean = jnp.mean(y, axis=-1, keepdims=True)
    var = jnp.mean((y - mean) ** 2, axis=-1, keepdims=True)
    ln = (y - mean) / jnp.sqrt(var + EPS) * gamma + beta
    return ln + x


if __name__ == "__main__":
    key = jax.random.PRNGKey(0)
    kx, kw = jax.random.split(key)

    # B deliberately NOT a multiple of the tile / sublane unit: exercises the
    # masked partial last block (no pad, no slice).
    B = 10
    x = jax.random.normal(kx, (B, SEQ), dtype=jnp.float32)
    # Deterministic parameter init, matching the module's __init__ shapes:
    complex_weight = jax.random.normal(kw, (1, FREQ, 2), dtype=jnp.float32) * 0.02
    gamma = jnp.ones((SEQ,), jnp.float32)    # LayerNorm weight init
    beta = jnp.zeros((SEQ,), jnp.float32)    # LayerNorm bias init

    # Build the folded filter matrix once (cached per weight update).
    M = jax.block_until_ready(build_filter_matrix(complex_weight))

    out = jax.block_until_ready(filter_layer(x, M, gamma, beta))
    ref = reference(x, complex_weight, gamma, beta)

    assert out.shape == (B, SEQ)
    max_err = float(jnp.max(jnp.abs(out - ref)))
    if not (max_err < 5e-2):
        raise SystemExit(f"kernel/reference mismatch: max_err={max_err}")

    print("KERNEL_OK")
</pallas_src>

<mosaic_0001>
module attributes {stable_mosaic.version = 11 : i64} {
  func.func @filter_layer_kernel(%arg0: i32, %arg1: memref<8x512xf32, #tpu.memory_space<vmem>>, %arg2: memref<512x512xbf16, #tpu.memory_space<vmem>>, %arg3: memref<1x512xf32, #tpu.memory_space<vmem>>, %arg4: memref<1x512xf32, #tpu.memory_space<vmem>>, %arg5: memref<8x512xf32, #tpu.memory_space<vmem>>) attributes {dimension_semantics = [#tpu.dimension_semantics<parallel>], iteration_bounds = array<i64: 2>, scalar_prefetch = 0 : i64, scratch_operands = 0 : i64, tpu.core_type = #tpu.core_type<tc>, window_params = [{transform_indices = @transform_0, window_bounds = array<i64: 8, 512>}, {pipeline_mode = #tpu.pipeline_mode<synchronous>, transform_indices = @transform_1, window_bounds = array<i64: 512, 512>}, {pipeline_mode = #tpu.pipeline_mode<synchronous>, transform_indices = @transform_2, window_bounds = array<i64: 1, 512>}, {pipeline_mode = #tpu.pipeline_mode<synchronous>, transform_indices = @transform_3, window_bounds = array<i64: 1, 512>}, {transform_indices = @transform_4, window_bounds = array<i64: 8, 512>}]} {
    %c0 = arith.constant 0 : index
    %c0_0 = arith.constant 0 : index
    %0 = vector.load %arg1[%c0, %c0_0] : memref<8x512xf32, #tpu.memory_space<vmem>>, vector<8x512xf32>
    %1 = arith.truncf %0 : vector<8x512xf32> to vector<8x512xbf16>
    %c0_1 = arith.constant 0 : index
    %c0_2 = arith.constant 0 : index
    %2 = vector.load %arg2[%c0_1, %c0_2] : memref<512x512xbf16, #tpu.memory_space<vmem>>, vector<512x512xbf16>
    %cst = arith.constant dense<0.000000e+00> : vector<8x512xf32>
    %3 = tpu.matmul %1, %2, %cst {dimension_numbers = #tpu.dot_dimension_numbers<[1], [0], [0], [1], [0, 0, 1, 1], [], []>} : vector<8x512xbf16>, vector<512x512xbf16>, vector<8x512xf32> -> vector<8x512xf32>
    %cst_3 = arith.constant dense<0.000000e+00> : vector<8xf32>
    %4 = vector.multi_reduction <add>, %3, %cst_3 [1] : vector<8x512xf32> to vector<8xf32>
    %5 = vector.shape_cast %4 : vector<8xf32> to vector<8x1xf32>
    %cst_4 = arith.constant 0.001953125 : f32
    %6 = vector.broadcast %cst_4 : f32 to vector<8x1xf32>
    %7 = arith.mulf %5, %6 : vector<8x1xf32>
    %8 = vector.broadcast %7 : vector<8x1xf32> to vector<8x512xf32>
    %9 = arith.subf %3, %8 : vector<8x512xf32>
    %10 = arith.mulf %9, %9 : vector<8x512xf32>
    %cst_5 = arith.constant dense<0.000000e+00> : vector<8xf32>
    %11 = vector.multi_reduction <add>, %10, %cst_5 [1] : vector<8x512xf32> to vector<8xf32>
    %12 = vector.shape_cast %11 : vector<8xf32> to vector<8x1xf32>
    %cst_6 = arith.constant 0.001953125 : f32
    %13 = vector.broadcast %cst_6 : f32 to vector<8x1xf32>
    %14 = arith.mulf %12, %13 : vector<8x1xf32>
    %cst_7 = arith.constant 9.99999996E-13 : f32
    %15 = vector.broadcast %cst_7 : f32 to vector<8x1xf32>
    %16 = arith.addf %14, %15 : vector<8x1xf32>
    %17 = math.rsqrt %16 : vector<8x1xf32>
    %18 = vector.broadcast %17 : vector<8x1xf32> to vector<8x512xf32>
    %19 = arith.mulf %9, %18 : vector<8x512xf32>
    %c0_8 = arith.constant 0 : index
    %c0_9 = arith.constant 0 : index
    %20 = vector.load %arg3[%c0_8, %c0_9] : memref<1x512xf32, #tpu.memory_space<vmem>>, vector<1x512xf32>
    %21 = vector.broadcast %20 : vector<1x512xf32> to vector<8x512xf32>
    %22 = arith.mulf %19, %21 : vector<8x512xf32>
    %c0_10 = arith.constant 0 : index
    %c0_11 = arith.constant 0 : index
    %23 = vector.load %arg4[%c0_10, %c0_11] : memref<1x512xf32, #tpu.memory_space<vmem>>, vector<1x512xf32>
    %24 = vector.broadcast %23 : vector<1x512xf32> to vector<8x512xf32>
    %25 = arith.addf %22, %24 : vector<8x512xf32>
    %26 = arith.addf %25, %0 : vector<8x512xf32>
    %c0_12 = arith.constant 0 : index
    %c0_13 = arith.constant 0 : index
    %27 = vector.load %arg5[%c0_12, %c0_13] : memref<8x512xf32, #tpu.memory_space<vmem>>, vector<8x512xf32>
    tpu.vector_store %arg5[%c0_12, %c0_13], %26 {strides = array<i32>} : memref<8x512xf32, #tpu.memory_space<vmem>>, vector<8x512xf32>,
    return
  }
  func.func @transform_0(%arg0: i32) -> (i32, i32) {
    %c0_i32 = arith.constant 0 : i32
    %c0_i32_0 = arith.constant 0 : i32
    return %arg0, %c0_i32 : i32, i32
  }
  func.func @transform_1(%arg0: i32) -> (i32, i32) {
    %c0_i32 = arith.constant 0 : i32
    %c0_i32_0 = arith.constant 0 : i32
    %c0_i32_1 = arith.constant 0 : i32
    return %c0_i32, %c0_i32_0 : i32, i32
  }
  func.func @transform_2(%arg0: i32) -> (i32, i32) {
    %c0_i32 = arith.constant 0 : i32
    %c0_i32_0 = arith.constant 0 : i32
    %c0_i32_1 = arith.constant 0 : i32
    return %c0_i32, %c0_i32_0 : i32, i32
  }
  func.func @transform_3(%arg0: i32) -> (i32, i32) {
    %c0_i32 = arith.constant 0 : i32
    %c0_i32_0 = arith.constant 0 : i32
    %c0_i32_1 = arith.constant 0 : i32
    return %c0_i32, %c0_i32_0 : i32, i32
  }
  func.func @transform_4(%arg0: i32) -> (i32, i32) {
    %c0_i32 = arith.constant 0 : i32
    %c0_i32_0 = arith.constant 0 : i32
    return %arg0, %c0_i32 : i32, i32
  }
}

</mosaic_0001>

<bundles_post_ra>
// kernel: filter_layer.1
= control target key start
LH: loop header
LB: loop body
LE: loop exit
PB: predicated region body
PF: predicated region fallthrough
CT: control target
= control target key end

     0   :  { %9 = vsyncpa [#allocation3], 0  ;;  %s2149_s0 = inlined_call_operand.hbm [shape: f32[10,512], index: 0, kind: input, shape index: {}]   ;;  %s2150_s1 = inlined_call_operand.hbm [shape: bf16[512,512], index: 1, kind: input, shape index: {}]   ;;  %s2151_s2 = inlined_call_operand.vmem [shape: f32[1,512], index: 2, kind: input, shape index: {}]   ;;  %s2152_s3 = inlined_call_operand.vmem [shape: f32[1,512], index: 3, kind: input, shape index: {}]   ;;  %s2153_s4 = inlined_call_operand.hbm [shape: f32[10,512], index: 4, kind: output, shape index: {}]  }
   0x1   :  { %11 = vsyncpa [#allocation3 + $0x1], 0 }
   0x2   :  { %12 = vsyncpa [#allocation6], 0 }
   0x3   :  { %13 = vsyncpa [#allocation4], 0 }
   0x4   :  { %15 = vsyncpa [#allocation4 + $0x1], 0  ;;  %s1917_s15 = smov 0   ;;  %s1919_s16 = smov 0  }
   0x5   :  { %s1921_s17 = smov 0   ;;  %s1923_s18 = smov 0  }
   0x6 LB: > { %s1938_s19 = sadd.s32 4294967295, %s1885_s18   ;;  %s1350_s20 = sadd.s32 4294967294, %s1885_s18   ;;  %s1885_s18 = sphi %s1923_s18, %s2173_s18   ;;  %s1881_s17 = sphi %s1921_s17, %s2172_s17   ;;  %s1877_s16 = sphi %s1919_s16, %s2171_s16   ;;  %s1873_s15 = sphi %s1917_s15, %s2170_s15  }
   0x7   : > { %p41_p0 = scmp.ne.s32.totalorder %s1877_s16, %s1873_s15  ;;  %p2154_p1 = scmp.eq.s32.totalorder %s1938_s19, 0 }
   0x8   : > { %p134_p3 = scmp.eq.s32.totalorder %s1350_s20, 1  ;;  %p1351_p5 = scmp.ge.s32.totalorder %s1885_s18, 1 }
   0x9   : > { %p1947_p4 = por %p2154_p1, %p41_p0  ;;  %p141_p7 = scmp.lt.s32.totalorder %s1885_s18, 3 }
   0xa   : > { %p1952_p6 = por %p134_p3, %p41_p0  ;;  %s1887_s24 = smov [#allocation5]  }
   0xb   : > { %s2157_s21 = scalar_select %p1947_p4, 1, 0 }
   0xc   : > { %s2158_s22 = scalar_select %p1952_p6, 1, 0 }
   0xd   : > { %p1957_p8 = pnand %p1351_p5, %p141_p7  ;;  %s153_s25 = sshll.u32 %s1887_s24, 4  ;;  %s1961_s25 = int_to_ptr.vmem [resolvable:$true] %s153_s25 }
   0xe   : > { %s1973_s27 = sadd.s32 1, %s1885_s18   ;;  %s28_s28 = sadd.s32 1, %s1881_s17 }
   0xf   : > { %s2159_s23 = scalar_select %p1957_p8, 1, 0 }
  0x10   : > { %p1512_p9 = pneg %p1957_p8  ;;  %s25_s29 = ssub.s32 %s1885_s18, %s1973_s27 }
  0x11   : > { %s1757_s6 = scalar_lea.hbm %s2150_s1, 16384 }
  0x12   : > { %p1968_p11 = pnand %p1512_p9, %p2154_p1  ;;  %p1758_p12 = scmp.ne.s32.totalorder %s2150_s1, %s1757_s6 }
  0x13   : > { %p1764_p5 = scmp.lt.u32.totalorder %s1757_s6, %s2150_s1 }
  0x14   : > { %p1759_p13 = pneg %p1968_p11 }
  0x16   : > { %p1760_p0 = pnand %p1759_p13, %p1758_p12 }
  0x18   : > { %p1761_p3 = pneg %p1760_p0 }
  0x1a   : > { %p1766_p7 = pnand %p1764_p5, %p1761_p3 }
  0x1c   : > { %1769 = shalt.err (!%p1766_p7)
}
  0x1d   : > { %s1770_s11 = scalar_lea.vmem %s1961_s25, 16384  ;;  %p1778_p2 = scmp.lt.s32.totalorder %s1961_s25, %s1961_s25 }
  0x1e   : > { %p1771_p9 = scmp.ne.s32.totalorder %s1961_s25, %s1770_s11  ;;  %p1779_p6 = scmp.lt.s32.totalorder %s1770_s11, %s1770_s11 }
  0x20   : > { %p1773_p10 = pnand %p1771_p9, %p1759_p13  ;;  %p1780_p4 = por %p1779_p6, %p1778_p2 }
  0x22   : > { %p1774_p1 = pneg %p1773_p10 }
  0x24   : > { %p1781_p8 = pnand %p1780_p4, %p1774_p1 }
  0x26   : > { %1784 = shalt.err (!%p1781_p8)
}
  0x27   : > { %s1888_s12 = smov 256   ;;  %s1889_s13 = smov 16  }
  0x28   : > { %1515 = dma.hbm_to_vmem [thread:$0]  (!%p1968_p11), %s2150_s1, 16384, %s1961_s25, [#allocation6], %s1888_s12, %s1888_s12, %s1889_s13  }
  0x29   : > { %p26_p2 = scmp.eq.s32.totalorder %s25_s29, 0  ;;  %p35_p1 = scmp.ne.s32.totalorder %s1881_s17, %s1877_s16 }
  0x2a   : > { %p36_p4 = scmp.eq.s32.totalorder %s1885_s18, 0  ;;  %p1525_p6 = scmp.lt.s32.totalorder %s1885_s18, 2 }
  0x2b   : > { %s2004_s24 = scalar_select %p26_p2, %s1881_s17, %s28_s28  }
  0x2c   : > { %p37_p8 = por %p36_p4, %p35_p1  ;;  %p2161_p10 = scmp.eq.s32.totalorder %s1938_s19, 1 }
  0x2d   : > { %s173_s5 = sand.u32 1, %s1881_s17   ;;  %s1494_s6 = sshll.u32 %s1885_s18, 9 }
  0x2e   : > { %p2008_p12 = por %p2161_p10, %p35_p1  ;;  %s1354_s7 = sshll.u32 %s173_s5, 5 }
  0x2f   : > { %s2017_s9 = scalar_lea.hbm %s2149_s0, %s1494_s6  ;;  %s177_s25 = scalar_lea.vmem [#allocation2], %s1354_s7 }
  0x30   : > { %s185_s28 = sshll.u32 %s177_s25, 4  ;;  %p2019_p11 = pnand %p1525_p6, %p37_p8  ;;  %s2023_s28 = int_to_ptr.vmem [resolvable:$true] %s185_s28 }
  0x31   : > { %s174_s10 = scalar_lea.sflag [#allocation3], %s173_s5  ;;  %s1785_s11 = scalar_lea.hbm %s2017_s9, 512 }
  0x32   : > { %p1786_p13 = scmp.ne.s32.totalorder %s2017_s9, %s1785_s11  ;;  %p1787_p0 = pneg %p2019_p11 }
  0x33   : > { %s1790_s14 = scalar_lea.hbm %s2149_s0, 1024  ;;  %p1791_p7 = scmp.lt.u32.totalorder %s2017_s9, %s2149_s0 }
  0x34   : > { %p1788_p3 = pnand %p1787_p0, %p1786_p13  ;;  %p1792_p9 = scmp.lt.u32.totalorder %s1790_s14, %s1785_s11 }
  0x35   : > { %p1794_p1 = scmp.lt.u32.totalorder %s1785_s11, %s2017_s9 }
  0x36   : > { %p1789_p5 = pneg %p1788_p3  ;;  %p1793_p2 = por %p1792_p9, %p1791_p7 }
  0x38   : > { %p1795_p4 = por %p1794_p1, %p1793_p2 }
  0x3a   : > { %p1796_p6 = pnand %p1795_p4, %p1789_p5 }
  0x3c   : > { %1799 = shalt.err (!%p1796_p6)
}
  0x3d   : > { %s1800_s5 = scalar_lea.vmem %s2023_s28, 512  ;;  %s1890_s7 = smov [#allocation2]  }
  0x3e   : > { %p1801_p8 = scmp.ne.s32.totalorder %s2023_s28, %s1800_s5  ;;  %s1805_s26 = sshll.u32 %s1890_s7, 4  ;;  %s1806_s26 = int_to_ptr.vmem [resolvable:$false] %s1805_s26 }
  0x3f   : > { %s1807_s8 = scalar_lea.vmem %s1806_s26, 1024  ;;  %p1808_p3 = scmp.lt.s32.totalorder %s2023_s28, %s1806_s26 }
  0x40   : > { %p1803_p10 = pnand %p1801_p8, %p1787_p0  ;;  %p1809_p7 = scmp.lt.s32.totalorder %s1807_s8, %s1800_s5 }
  0x42   : > { %p1804_p13 = pneg %p1803_p10  ;;  %p1810_p9 = por %p1809_p7, %p1808_p3 }
  0x44   : > { %p1811_p2 = pnand %p1810_p9, %p1804_p13 }
  0x46   : > { %1814 = shalt.err (!%p1811_p2)
}
  0x47   : > { %1519 = dma.hbm_to_vmem [thread:$0]  (!%p2019_p11), %s2017_s9, 512, %s2023_s28, %s174_s10  }
  0x48   : > { %p2164_p5 = scmp.ne.s32.totalorder %s2159_s23, 0 }
  0x49   : > { %s2053_s25 = sand.u32 (!%p2164_p5), 1, %s1877_s16   ;;  %p2165_p0 = scmp.ne.s32.totalorder (!%p2164_p5), %s2157_s21, 0 }
  0x4a   : > { %194 = sbr.rel (%p2164_p5) target bundleno = 767 (0x2ff), region = 36  ;;  %s1358_s11 = sshll.u32 (!%p2164_p5), %s2053_s25, 5 }
  0x4b   : > { %s197_s12 = scalar_lea.sflag (!%p2164_p5), [#allocation3], %s2053_s25  ;;  %s2059_s13 = scalar_lea.vmem (!%p2164_p5), [#allocation2], %s1358_s11 }
  0x51   : > { %1860 = dma.done.wait (%p2165_p0), %s197_s12, 512  }
  0x52   : > { %1862 = vsyncadd (%p2165_p0), %s197_s12, 4294966784  ;;  %p2166_p11 = scmp.eq.s32.totalorder %s1938_s19, 0 }
  0x54   : > { %1864 = dma.done.wait (%p2166_p11), [#allocation6], 16384   ;;  %p2167_p1 = pmov %p2166_p11 }
  0x55   : > { %v1563_v0 = vld [vmem:[#allocation5 + $0x4] ss:$16 sps:$4 sm:$0xff]   ;;  %v1565_v1 = vld [vmem:[#allocation5 + $0xc] ss:$16 sps:$4 sm:$0xff]   ;;  %v1567_v2 = vld [vmem:[#allocation5] ss:$16 sps:$4 sm:$0xff]  }
  0x56   : > { %1866 = vsyncadd (%p2167_p1), [#allocation6], 4294950912  ;;  %1005 = vmatprep.subr.bf16.mxu0 %v1563_v0  ;;  %v1568_v3 = vld [vmem:[#allocation5 + $0x8] ss:$16 sps:$4 sm:$0xff]   ;;  %1087 = vmatprep.subr.bf16.mxu1 %v1565_v1  ;;  %v1569_v4 = vld [vmem:[#allocation5 + $0x24] ss:$16 sps:$4 sm:$0xff]  }
  0x57   : > { %1006 = vmatpush1.bf16.msra.mxu0 %v1567_v2  ;;  %1088 = vmatpush1.bf16.msra.mxu1 %v1568_v3  ;;  %v1571_v5 = vld [vmem:[#allocation5 + $0x2c] ss:$16 sps:$4 sm:$0xff]   ;;  %v1573_v6 = vld [vmem:[#allocation5 + $0x20] ss:$16 sps:$4 sm:$0xff]   ;;  %v1574_v7 = vld [vmem:[#allocation5 + $0x28] ss:$16 sps:$4 sm:$0xff]  }
  0x58   : > { %1007 = vmatprep.subr.bf16.mxu0 %v1569_v4  ;;  %1089 = vmatprep.subr.bf16.mxu1 %v1571_v5  ;;  %v1575_v8 = vld [vmem:[#allocation5 + $0x44] ss:$16 sps:$4 sm:$0xff]   ;;  %v1577_v9 = vld [vmem:[#allocation5 + $0x4c] ss:$16 sps:$4 sm:$0xff]   ;;  %v1579_v10 = vld [vmem:[#allocation5 + $0x40] ss:$16 sps:$4 sm:$0xff]  }
  0x59   : > { %v1580_v11 = vld [vmem:[#allocation5 + $0x48] ss:$16 sps:$4 sm:$0xff]   ;;  %v1581_v12 = vld [vmem:[#allocation5 + $0x64] ss:$16 sps:$4 sm:$0xff]   ;;  %v1583_v13 = vld [vmem:[#allocation5 + $0x6c] ss:$16 sps:$4 sm:$0xff]  }
  0x5a   : > { %v1585_v14 = vld [vmem:[#allocation5 + $0x60] ss:$16 sps:$4 sm:$0xff]   ;;  %v1586_v15 = vld [vmem:[#allocation5 + $0x68] ss:$16 sps:$4 sm:$0xff]   ;;  %v1587_v16 = vld [vmem:[#allocation5 + $0x84] ss:$16 sps:$4 sm:$0xff]  }
  0x5b   : > { %1008 = vmatpush1.bf16.msra.mxu0 %v1573_v6  ;;  %1090 = vmatpush1.bf16.msra.mxu1 %v1574_v7  ;;  %v1589_v17 = vld [vmem:[#allocation5 + $0x8c] ss:$16 sps:$4 sm:$0xff]   ;;  %v1591_v18 = vld [vmem:[#allocation5 + $0x80] ss:$16 sps:$4 sm:$0xff]   ;;  %v1592_v19 = vld [vmem:[#allocation5 + $0x88] ss:$16 sps:$4 sm:$0xff]  }
  0x5c   : > { %1009 = vmatprep.subr.bf16.mxu0 %v1575_v8  ;;  %1091 = vmatprep.subr.bf16.mxu1 %v1577_v9  ;;  %v1593_v20 = vld [vmem:[#allocation5 + $0xa4] ss:$16 sps:$4 sm:$0xff]   ;;  %v1595_v21 = vld [vmem:[#allocation5 + $0xac] ss:$16 sps:$4 sm:$0xff]   ;;  %v1597_v22 = vld [vmem:[#allocation5 + $0xa0] ss:$16 sps:$4 sm:$0xff]  }
  0x5d   : > { %v1598_v23 = vld [vmem:[#allocation5 + $0xa8] ss:$16 sps:$4 sm:$0xff]   ;;  %v1599_v24 = vld [vmem:[#allocation5 + $0xc4] ss:$16 sps:$4 sm:$0xff]   ;;  %v1601_v25 = vld [vmem:[#allocation5 + $0xcc] ss:$16 sps:$4 sm:$0xff]  }
  0x5e   : > { %v1603_v26 = vld [vmem:[#allocation5 + $0xc0] ss:$16 sps:$4 sm:$0xff]   ;;  %v1604_v27 = vld [vmem:[#allocation5 + $0xc8] ss:$16 sps:$4 sm:$0xff]   ;;  %v1605_v28 = vld [vmem:[#allocation5 + $0xe4] ss:$16 sps:$4 sm:$0xff]  }
  0x5f   : > { %1010 = vmatpush1.bf16.msra.mxu0 %v1579_v10  ;;  %1092 = vmatpush1.bf16.msra.mxu1 %v1580_v11  ;;  %v1607_v29 = vld [vmem:[#allocation5 + $0xec] ss:$16 sps:$4 sm:$0xff]   ;;  %v1609_v30 = vld [vmem:[#allocation5 + $0xe0] ss:$16 sps:$4 sm:$0xff]   ;;  %v1610_v31 = vld [vmem:[#allocation5 + $0xe8] ss:$16 sps:$4 sm:$0xff]  }
  0x60   : > { %1011 = vmatprep.subr.bf16.mxu0 %v1581_v12  ;;  %1093 = vmatprep.subr.bf16.mxu1 %v1583_v13  ;;  %v1611_v32 = vld [vmem:[#allocation5 + $0x104] ss:$16 sps:$4 sm:$0xff]   ;;  %v1613_v33 = vld [vmem:[#allocation5 + $0x10c] ss:$16 sps:$4 sm:$0xff]   ;;  %v1615_v34 = vld [vmem:[#allocation5 + $0x100] ss:$16 sps:$4 sm:$0xff]  }
  0x61   : > { %v1616_v35 = vld [vmem:[#allocation5 + $0x108] ss:$16 sps:$4 sm:$0xff]   ;;  %v1617_v36 = vld [vmem:[#allocation5 + $0x124] ss:$16 sps:$4 sm:$0xff]   ;;  %v1619_v37 = vld [vmem:[#allocation5 + $0x12c] ss:$16 sps:$4 sm:$0xff]  }
  0x62   : > { %v1621_v38 = vld [vmem:[#allocation5 + $0x120] ss:$16 sps:$4 sm:$0xff]   ;;  %v1622_v39 = vld [vmem:[#allocation5 + $0x128] ss:$16 sps:$4 sm:$0xff]   ;;  %v1623_v40 = vld [vmem:[#allocation5 + $0x144] ss:$16 sps:$4 sm:$0xff]  }
  0x63   : > { %1012 = vmatpush1.bf16.msra.mxu0 %v1585_v14  ;;  %1094 = vmatpush1.bf16.msra.mxu1 %v1586_v15  ;;  %v1625_v41 = vld [vmem:[#allocation5 + $0x14c] ss:$16 sps:$4 sm:$0xff]   ;;  %v1627_v42 = vld [vmem:[#allocation5 + $0x140] ss:$16 sps:$4 sm:$0xff]   ;;  %v1628_v43 = vld [vmem:[#allocation5 + $0x148] ss:$16 sps:$4 sm:$0xff]  }
  0x64   : > { %1013 = vmatprep.subr.bf16.mxu0 %v1587_v16  ;;  %1095 = vmatprep.subr.bf16.mxu1 %v1589_v17  ;;  %v1629_v44 = vld [vmem:[#allocation5 + $0x164] ss:$16 sps:$4 sm:$0xff]   ;;  %v1631_v45 = vld [vmem:[#allocation5 + $0x16c] ss:$16 sps:$4 sm:$0xff]   ;;  %v1633_v47 = vld [vmem:[#allocation5 + $0x160] ss:$16 sps:$4 sm:$0xff]  }
  0x65   : > { %v2070_v46 = vld [vmem:[%s2059_s13 + $0x8] sm:$0xff]  ;;  %v1635_v50 = vld [vmem:[#allocation5 + $0x184] ss:$16 sps:$4 sm:$0xff]   ;;  %v1639_v52 = vld [vmem:[#allocation5 + $0x180] ss:$16 sps:$4 sm:$0xff]   ;;  %s1495_s29 = sshll.u32 %s1938_s19, 9 }
  0x66   : > { %v234_v48 = vpack.c.bf16 %v2070_v46, %v2070_v46  ;;  %v1634_v49 = vld [vmem:[#allocation5 + $0x168] ss:$16 sps:$4 sm:$0xff]   ;;  %v1637_v51 = vld [vmem:[#allocation5 + $0x18c] ss:$16 sps:$4 sm:$0xff]   ;;  %v1641_v54 = vld [vmem:[#allocation5 + $0x1a4] ss:$16 sps:$4 sm:$0xff]   ;;  %s2105_s19 = scalar_lea.hbm %s2153_s4, %s1495_s29 }
  0x67   : > { %1014 = vmatpush1.bf16.msra.mxu0 %v1591_v18  ;;  %1096 = vmatpush1.bf16.msra.mxu1 %v1592_v19  ;;  %v1640_v53 = vld [vmem:[#allocation5 + $0x188] ss:$16 sps:$4 sm:$0xff]   ;;  %v1643_v55 = vld [vmem:[#allocation5 + $0x1ac] ss:$16 sps:$4 sm:$0xff]   ;;  %v1645_v56 = vld [vmem:[#allocation5 + $0x1a0] ss:$16 sps:$4 sm:$0xff]  }
  0x68   : > { %1015 = vmatprep.subr.bf16.mxu0 %v1593_v20  ;;  %1097 = vmatprep.subr.bf16.mxu1 %v1595_v21  ;;  %v1646_v57 = vld [vmem:[#allocation5 + $0x1a8] ss:$16 sps:$4 sm:$0xff]   ;;  %v1647_v58 = vld [vmem:[#allocation5 + $0x1c4] ss:$16 sps:$4 sm:$0xff]   ;;  %v1649_v59 = vld [vmem:[#allocation5 + $0x1cc] ss:$16 sps:$4 sm:$0xff]  }
  0x69   : > { %1037 = vmatprep.mubr.bf16.mxu0 %v234_v48  ;;  %1119 = vmatprep.mubr.bf16.mxu1 %v234_v48  ;;  %v1651_v60 = vld [vmem:[#allocation5 + $0x1c0] ss:$16 sps:$4 sm:$0xff]   ;;  %v1652_v61 = vld [vmem:[#allocation5 + $0x1c8] ss:$16 sps:$4 sm:$0xff]   ;;  %v1653_v62 = vld [vmem:[#allocation5 + $0x1e4] ss:$16 sps:$4 sm:$0xff]  }
  0x6a   : > { %v1655_v63 = vld [vmem:[#allocation5 + $0x1ec] ss:$16 sps:$4 sm:$0xff]   ;;  %v1657_v0 = vld [vmem:[#allocation5 + $0x1e0] ss:$16 sps:$4 sm:$0xff]   ;;  %v1658_v1 = vld [vmem:[#allocation5 + $0x1e8] ss:$16 sps:$4 sm:$0xff]  }
  0x6b   : > { %1016 = vmatpush1.bf16.msra.mxu0 %v1597_v22  ;;  %1098 = vmatpush1.bf16.msra.mxu1 %v1598_v23  ;;  %v2075_v2 = vld [vmem:[%s2059_s13] sm:$0xff]  ;;  %v1664_v4 = vld [vmem:[#allocation5 + $0x20c] ss:$16 sps:$4 sm:$0xff]   ;;  %v1662_v7 = vld [vmem:[#allocation5 + $0x208] ss:$16 sps:$4 sm:$0xff]   ;;  %s228_s10 = scalar_lea.vmem [#allocation7], %s1358_s11 }
  0x6c   : > { %1017 = vmatprep.subr.bf16.mxu0 %v1599_v24  ;;  %1099 = vmatprep.subr.bf16.mxu1 %v1601_v25  ;;  %v1661_v3 = vld [vmem:[#allocation5 + $0x204] ss:$16 sps:$4 sm:$0xff]   ;;  %v233_v5 = vpack.c.bf16 %v2075_v2, %v2075_v2  ;;  %v1659_v6 = vld [vmem:[#allocation5 + $0x200] ss:$16 sps:$4 sm:$0xff]   ;;  %v1670_v9 = vld [vmem:[#allocation5 + $0x22c] ss:$16 sps:$4 sm:$0xff]  }
  0x6d   : > { %v1667_v8 = vld [vmem:[#allocation5 + $0x224] ss:$16 sps:$4 sm:$0xff]   ;;  %v1665_v10 = vld [vmem:[#allocation5 + $0x220] ss:$16 sps:$4 sm:$0xff]   ;;  %v1668_v11 = vld [vmem:[#allocation5 + $0x228] ss:$16 sps:$4 sm:$0xff]  }
  0x6e   : > { %v1673_v12 = vld [vmem:[#allocation5 + $0x244] ss:$16 sps:$4 sm:$0xff]   ;;  %v1676_v13 = vld [vmem:[#allocation5 + $0x24c] ss:$16 sps:$4 sm:$0xff]   ;;  %v1671_v14 = vld [vmem:[#allocation5 + $0x240] ss:$16 sps:$4 sm:$0xff]  }
  0x6f   : > { %1018 = vmatpush1.bf16.msra.mxu0 %v1603_v26  ;;  %1100 = vmatpush1.bf16.msra.mxu1 %v1604_v27  ;;  %v1674_v15 = vld [vmem:[#allocation5 + $0x248] ss:$16 sps:$4 sm:$0xff]   ;;  %v1679_v16 = vld [vmem:[#allocation5 + $0x264] ss:$16 sps:$4 sm:$0xff]   ;;  %v1682_v17 = vld [vmem:[#allocation5 + $0x26c] ss:$16 sps:$4 sm:$0xff]  }
  0x70   : > { %1019 = vmatprep.subr.bf16.mxu0 %v1605_v28  ;;  %1101 = vmatprep.subr.bf16.mxu1 %v1607_v29  ;;  %v1677_v18 = vld [vmem:[#allocation5 + $0x260] ss:$16 sps:$4 sm:$0xff]   ;;  %v1680_v19 = vld [vmem:[#allocation5 + $0x268] ss:$16 sps:$4 sm:$0xff]   ;;  %v1685_v20 = vld [vmem:[#allocation5 + $0x284] ss:$16 sps:$4 sm:$0xff]  }
  0x71   : > { %v1688_v21 = vld [vmem:[#allocation5 + $0x28c] ss:$16 sps:$4 sm:$0xff]   ;;  %v1683_v22 = vld [vmem:[#allocation5 + $0x280] ss:$16 sps:$4 sm:$0xff]   ;;  %v1686_v23 = vld [vmem:[#allocation5 + $0x288] ss:$16 sps:$4 sm:$0xff]  }
  0x72   : > { %v1691_v24 = vld [vmem:[#allocation5 + $0x2a4] ss:$16 sps:$4 sm:$0xff]   ;;  %v1694_v25 = vld [vmem:[#allocation5 + $0x2ac] ss:$16 sps:$4 sm:$0xff]   ;;  %v1689_v26 = vld [vmem:[#allocation5 + $0x2a0] ss:$16 sps:$4 sm:$0xff]  }
  0x73   : > { %1020 = vmatpush1.bf16.msra.mxu0 %v1609_v30  ;;  %1102 = vmatpush1.bf16.msra.mxu1 %v1610_v31  ;;  %v1692_v27 = vld [vmem:[#allocation5 + $0x2a8] ss:$16 sps:$4 sm:$0xff]   ;;  %v1697_v28 = vld [vmem:[#allocation5 + $0x2c4] ss:$16 sps:$4 sm:$0xff]   ;;  %v1700_v29 = vld [vmem:[#allocation5 + $0x2cc] ss:$16 sps:$4 sm:$0xff]  }
  0x74   : > { %1021 = vmatprep.subr.bf16.mxu0 %v1611_v32  ;;  %1103 = vmatprep.subr.bf16.mxu1 %v1613_v33  ;;  %v2080_v30 = vld [vmem:[%s2059_s13 + $0x18] sm:$0xff]  ;;  %v1695_v32 = vld [vmem:[#allocation5 + $0x2c0] ss:$16 sps:$4 sm:$0xff]   ;;  %s1270_s14 = sshll.u32 %s228_s10, 4  ;;  %s1256_s5 = scalar_lea.sflag [#allocation4], %s2053_s25  ;;  %s2107_s14 = int_to_ptr.vmem [resolvable:$true] %s1270_s14 }
  0x75   : > { %v236_v31 = vpack.c.bf16 %v2080_v30, %v2080_v30  ;;  %v1698_v33 = vld [vmem:[#allocation5 + $0x2c8] ss:$16 sps:$4 sm:$0xff]   ;;  %v1724_v48 = vld [vmem:[#allocation5 + $0x34c] ss:$16 sps:$4 sm:$0xff]   ;;  %s1815_s7 = scalar_lea.vmem %s2107_s14, 512  ;;  %s1891_s26 = smov [#allocation7]  }
  0x76   : > { %p1816_p4 = scmp.ne.s32.totalorder %s2107_s14, %s1815_s7  ;;  %s1819_s8 = sshll.u32 %s1891_s26, 4  ;;  %s1820_s8 = int_to_ptr.vmem [resolvable:$false] %s1819_s8 }
  0x77   : > { %1022 = vmatpush1.bf16.msra.mxu0 %v1615_v34  ;;  %1104 = vmatpush1.bf16.msra.mxu1 %v1616_v35  ;;  %v1703_v34 = vld [vmem:[#allocation5 + $0x2e4] ss:$16 sps:$4 sm:$0xff]   ;;  %v1706_v35 = vld [vmem:[#allocation5 + $0x2ec] ss:$16 sps:$4 sm:$0xff]   ;;  %s1821_s11 = scalar_lea.vmem %s1820_s8, 1024  ;;  %p1822_p10 = scmp.lt.s32.totalorder %s2107_s14, %s1820_s8 }
  0x78   : > { %1023 = vmatprep.subr.bf16.mxu0 %v1617_v36  ;;  %1105 = vmatprep.subr.bf16.mxu1 %v1619_v37  ;;  %v1701_v36 = vld [vmem:[#allocation5 + $0x2e0] ss:$16 sps:$4 sm:$0xff]   ;;  %v1704_v37 = vld [vmem:[#allocation5 + $0x2e8] ss:$16 sps:$4 sm:$0xff]   ;;  %p1817_p6 = pnand %p1816_p4, %p2008_p12  ;;  %p1823_p13 = scmp.lt.s32.totalorder %s1821_s11, %s1815_s7 }
  0x7a   : > { %p1818_p8 = pneg %p1817_p6  ;;  %p1824_p3 = por %p1823_p13, %p1822_p10 }
  0x7b   : > { %1024 = vmatpush1.bf16.msra.mxu0 %v1621_v38  ;;  %1106 = vmatpush1.bf16.msra.mxu1 %v1622_v39  ;;  %v1709_v38 = vld [vmem:[#allocation5 + $0x304] ss:$16 sps:$4 sm:$0xff]   ;;  %v1712_v39 = vld [vmem:[#allocation5 + $0x30c] ss:$16 sps:$4 sm:$0xff]  }
  0x7c   : > { %1025 = vmatprep.subr.bf16.mxu0 %v1623_v40  ;;  %1107 = vmatprep.subr.bf16.mxu1 %v1625_v41  ;;  %v1707_v40 = vld [vmem:[#allocation5 + $0x300] ss:$16 sps:$4 sm:$0xff]   ;;  %v1710_v41 = vld [vmem:[#allocation5 + $0x308] ss:$16 sps:$4 sm:$0xff]   ;;  %p1825_p7 = pnand %p1824_p3, %p1818_p8 }
  0x7f   : > { %1026 = vmatpush1.bf16.msra.mxu0 %v1627_v42  ;;  %1108 = vmatpush1.bf16.msra.mxu1 %v1628_v43  ;;  %v1715_v42 = vld [vmem:[#allocation5 + $0x324] ss:$16 sps:$4 sm:$0xff]   ;;  %v1718_v43 = vld [vmem:[#allocation5 + $0x32c] ss:$16 sps:$4 sm:$0xff]  }
  0x80   : > { %1027 = vmatprep.subr.bf16.mxu0 %v1629_v44  ;;  %1109 = vmatprep.subr.bf16.mxu1 %v1631_v45  ;;  %v1713_v44 = vld [vmem:[#allocation5 + $0x320] ss:$16 sps:$4 sm:$0xff]   ;;  %v1716_v45 = vld [vmem:[#allocation5 + $0x328] ss:$16 sps:$4 sm:$0xff]  }
  0x83   : > { %1028 = vmatpush1.bf16.msra.mxu0 %v1633_v47  ;;  %1110 = vmatpush1.bf16.msra.mxu1 %v1634_v49  ;;  %v1721_v47 = vld [vmem:[#allocation5 + $0x344] ss:$16 sps:$4 sm:$0xff]   ;;  %v1719_v49 = vld [vmem:[#allocation5 + $0x340] ss:$16 sps:$4 sm:$0xff]  }
  0x84   : > { %1029 = vmatprep.subr.bf16.mxu0 %v1635_v50  ;;  %1111 = vmatprep.subr.bf16.mxu1 %v1637_v51  ;;  %v1722_v50 = vld [vmem:[#allocation5 + $0x348] ss:$16 sps:$4 sm:$0xff]   ;;  %v1727_v51 = vld [vmem:[#allocation5 + $0x364] ss:$16 sps:$4 sm:$0xff]  }
  0x87   : > { %1030 = vmatpush1.bf16.msra.mxu0 %v1639_v52  ;;  %1112 = vmatpush1.bf16.msra.mxu1 %v1640_v53  ;;  %v1730_v52 = vld [vmem:[#allocation5 + $0x36c] ss:$16 sps:$4 sm:$0xff]   ;;  %v1725_v53 = vld [vmem:[#allocation5 + $0x360] ss:$16 sps:$4 sm:$0xff]  }
  0x88   : > { %1031 = vmatprep.subr.bf16.mxu0 %v1641_v54  ;;  %1113 = vmatprep.subr.bf16.mxu1 %v1643_v55  ;;  %v1728_v54 = vld [vmem:[#allocation5 + $0x368] ss:$16 sps:$4 sm:$0xff]   ;;  %v1733_v55 = vld [vmem:[#allocation5 + $0x384] ss:$16 sps:$4 sm:$0xff]  }
  0x8b   : > { %1032 = vmatpush1.bf16.msra.mxu0 %v1645_v56  ;;  %1114 = vmatpush1.bf16.msra.mxu1 %v1646_v57  ;;  %v1736_v56 = vld [vmem:[#allocation5 + $0x38c] ss:$16 sps:$4 sm:$0xff]   ;;  %v1731_v57 = vld [vmem:[#allocation5 + $0x380] ss:$16 sps:$4 sm:$0xff]  }
  0x8c   : > { %1033 = vmatprep.subr.bf16.mxu0 %v1647_v58  ;;  %1115 = vmatprep.subr.bf16.mxu1 %v1649_v59  ;;  %v1734_v58 = vld [vmem:[#allocation5 + $0x388] ss:$16 sps:$4 sm:$0xff]   ;;  %v1739_v59 = vld [vmem:[#allocation5 + $0x3a4] ss:$16 sps:$4 sm:$0xff]  }
  0x8f   : > { %1034 = vmatpush1.bf16.msra.mxu0 %v1651_v60  ;;  %1116 = vmatpush1.bf16.msra.mxu1 %v1652_v61  ;;  %v1742_v60 = vld [vmem:[#allocation5 + $0x3ac] ss:$16 sps:$4 sm:$0xff]   ;;  %v1737_v61 = vld [vmem:[#allocation5 + $0x3a0] ss:$16 sps:$4 sm:$0xff]  }
  0x90   : > { %1035 = vmatprep.subr.bf16.mxu0 %v1653_v62  ;;  %1117 = vmatprep.subr.bf16.mxu1 %v1655_v63  ;;  %v1740_v62 = vld [vmem:[#allocation5 + $0x3a8] ss:$16 sps:$4 sm:$0xff]   ;;  %v1745_v63 = vld [vmem:[#allocation5 + $0x3c4] ss:$16 sps:$4 sm:$0xff]  }
  0x93   : > { %1036 = vmatpush1.bf16.msra.mxu0 %v1657_v0  ;;  %1118 = vmatpush1.bf16.msra.mxu1 %v1658_v1  ;;  %v1748_v0 = vld [vmem:[#allocation5 + $0x3cc] ss:$16 sps:$4 sm:$0xff]   ;;  %v1743_v1 = vld [vmem:[#allocation5 + $0x3c0] ss:$16 sps:$4 sm:$0xff]  }
  0x94   : > { %1046 = vmatprep.subr.bf16.mxu0 %v1661_v3  ;;  %1128 = vmatprep.subr.bf16.mxu1 %v1664_v4  ;;  %v1746_v3 = vld [vmem:[#allocation5 + $0x3c8] ss:$16 sps:$4 sm:$0xff]   ;;  %v1751_v4 = vld [vmem:[#allocation5 + $0x3e4] ss:$16 sps:$4 sm:$0xff]  }
  0x96   : > { %1038 = vmatmul.mubr.bf16.vlgmr.msra.gmra.mrb[0].mxu0 %v233_v5  ;;  %1120 = vmatmul.mubr.bf16.vlgmr.msra.gmra.mrb[0].mxu1 %v233_v5  ;;  %v1754_v5 = vld [vmem:[#allocation5 + $0x3ec] ss:$16 sps:$4 sm:$0xff]  }
  0x97   : > { %1047 = vmatpush1.bf16.msra.mxu0 %v1659_v6  ;;  %1129 = vmatpush1.bf16.msra.mxu1 %v1662_v7  ;;  %v1749_v6 = vld [vmem:[#allocation5 + $0x3e0] ss:$16 sps:$4 sm:$0xff]   ;;  %v1752_v7 = vld [vmem:[#allocation5 + $0x3e8] ss:$16 sps:$4 sm:$0xff]  }
  0x98   : > { %1048 = vmatprep.subr.bf16.mxu0 %v1667_v8  ;;  %1130 = vmatprep.subr.bf16.mxu1 %v1670_v9  ;;  %v2085_v8 = vld [vmem:[%s2059_s13 + $0x10] sm:$0xff] }
  0x99   : > { %1078 = vmatprep.mubr.bf16.mxu0 %v236_v31  ;;  %1160 = vmatprep.mubr.bf16.mxu1 %v236_v31  ;;  %v235_v9 = vpack.c.bf16 %v2085_v8, %v2085_v8 }
  0x9b   : > { %1049 = vmatpush1.bf16.msra.mxu0 %v1665_v10  ;;  %1131 = vmatpush1.bf16.msra.mxu1 %v1668_v11 }
  0x9c   : > { %1050 = vmatprep.subr.bf16.mxu0 %v1673_v12  ;;  %1132 = vmatprep.subr.bf16.mxu1 %v1676_v13 }
  0x9f   : > { %1051 = vmatpush1.bf16.msra.mxu0 %v1671_v14  ;;  %1133 = vmatpush1.bf16.msra.mxu1 %v1674_v15 }
  0xa0   : > { %1052 = vmatprep.subr.bf16.mxu0 %v1679_v16  ;;  %1134 = vmatprep.subr.bf16.mxu1 %v1682_v17 }
  0xa3   : > { %1053 = vmatpush1.bf16.msra.mxu0 %v1677_v18  ;;  %1135 = vmatpush1.bf16.msra.mxu1 %v1680_v19 }
  0xa4   : > { %1054 = vmatprep.subr.bf16.mxu0 %v1685_v20  ;;  %1136 = vmatprep.subr.bf16.mxu1 %v1688_v21 }
  0xa7   : > { %1055 = vmatpush1.bf16.msra.mxu0 %v1683_v22  ;;  %1137 = vmatpush1.bf16.msra.mxu1 %v1686_v23 }
  0xa8   : > { %1056 = vmatprep.subr.bf16.mxu0 %v1691_v24  ;;  %1138 = vmatprep.subr.bf16.mxu1 %v1694_v25 }
  0xab   : > { %1057 = vmatpush1.bf16.msra.mxu0 %v1689_v26  ;;  %1139 = vmatpush1.bf16.msra.mxu1 %v1692_v27 }
  0xac   : > { %1058 = vmatprep.subr.bf16.mxu0 %v1697_v28  ;;  %1140 = vmatprep.subr.bf16.mxu1 %v1700_v29 }
  0xaf   : > { %1059 = vmatpush1.bf16.msra.mxu0 %v1695_v32  ;;  %1141 = vmatpush1.bf16.msra.mxu1 %v1698_v33 }
  0xb0   : > { %1060 = vmatprep.subr.bf16.mxu0 %v1703_v34  ;;  %1142 = vmatprep.subr.bf16.mxu1 %v1706_v35 }
  0xb3   : > { %1061 = vmatpush1.bf16.msra.mxu0 %v1701_v36  ;;  %1143 = vmatpush1.bf16.msra.mxu1 %v1704_v37  ;;  %v1197_v37 = vlaneseq }
  0xb4   : > { %1062 = vmatprep.subr.bf16.mxu0 %v1709_v38  ;;  %1144 = vmatprep.subr.bf16.mxu1 %v1712_v39 }
  0xb5   : > { %v1198_v39 = vshrl.u32 %v1197_v37, 7 }
  0xb7   : > { %1063 = vmatpush1.bf16.msra.mxu0 %v1707_v40  ;;  %1145 = vmatpush1.bf16.msra.mxu1 %v1710_v41  ;;  %v1199_v40 = vsub.s32 0, %v1198_v39  ;;  %v1203_v41 = vsub.s32 1, %v1198_v39 }
  0xb8   : > { %1064 = vmatprep.subr.bf16.mxu0 %v1715_v42  ;;  %1146 = vmatprep.subr.bf16.mxu1 %v1718_v43  ;;  %v1207_v42 = vsub.s32 2, %v1198_v39  ;;  %v1211_v43 = vsub.s32 3, %v1198_v39 }
  0xbb   : > { %1065 = vmatpush1.bf16.msra.mxu0 %v1713_v44  ;;  %1147 = vmatpush1.bf16.msra.mxu1 %v1716_v45  ;;  %v1195_v44 = vld [vmem:[%s2151_s2] sm:$0xf] }
  0xbc   : > { %1066 = vmatprep.subr.bf16.mxu0 %v1721_v47  ;;  %1148 = vmatprep.subr.bf16.mxu1 %v1724_v48  ;;  %v1221_v45 = vld [vmem:[%s2152_s3] sm:$0xf]  ;;  %v1200_v47 = vrot.slane %v1195_v44, %v1199_v40  ;;  %v1204_v48 = vrot.slane %v1195_v44, %v1203_v41 }
  0xbf   : > { %1067 = vmatpush1.bf16.msra.mxu0 %v1719_v49  ;;  %1149 = vmatpush1.bf16.msra.mxu1 %v1722_v50  ;;  %v1208_v49 = vrot.slane %v1195_v44, %v1207_v42  ;;  %v1212_v50 = vrot.slane %v1195_v44, %v1211_v43 }
  0xc0   : > { %1068 = vmatprep.subr.bf16.mxu0 %v1727_v51  ;;  %1150 = vmatprep.subr.bf16.mxu1 %v1730_v52  ;;  %v1226_v52 = vrot.slane %v1221_v45, %v1199_v40 }
  0xc3   : > { %1069 = vmatpush1.bf16.msra.mxu0 %v1725_v53  ;;  %1151 = vmatpush1.bf16.msra.mxu1 %v1728_v54  ;;  %v1230_v53 = vrot.slane %v1221_v45, %v1203_v41  ;;  %v1234_v54 = vrot.slane %v1221_v45, %v1207_v42 }
  0xc4   : > { %1070 = vmatprep.subr.bf16.mxu0 %v1733_v55  ;;  %1152 = vmatprep.subr.bf16.mxu1 %v1736_v56  ;;  %v1238_v55 = vrot.slane %v1221_v45, %v1211_v43 }
  0xc7   : > { %1071 = vmatpush1.bf16.msra.mxu0 %v1731_v57  ;;  %1153 = vmatpush1.bf16.msra.mxu1 %v1734_v58 }
  0xc8   : > { %1072 = vmatprep.subr.bf16.mxu0 %v1739_v59  ;;  %1154 = vmatprep.subr.bf16.mxu1 %v1742_v60 }
  0xcb   : > { %1073 = vmatpush1.bf16.msra.mxu0 %v1737_v61  ;;  %1155 = vmatpush1.bf16.msra.mxu1 %v1740_v62 }
  0xcc   : > { %1074 = vmatprep.subr.bf16.mxu0 %v1745_v63  ;;  %1156 = vmatprep.subr.bf16.mxu1 %v1748_v0 }
  0xcf   : > { %1075 = vmatpush1.bf16.msra.mxu0 %v1743_v1  ;;  %1157 = vmatpush1.bf16.msra.mxu1 %v1746_v3 }
  0xd0   : > { %1076 = vmatprep.subr.bf16.mxu0 %v1751_v4  ;;  %1158 = vmatprep.subr.bf16.mxu1 %v1754_v5 }
  0xd3   : > { %1077 = vmatpush1.bf16.msra.mxu0 %v1749_v6  ;;  %1159 = vmatpush1.bf16.msra.mxu1 %v1752_v7 }
  0xd6   : > { %1079 = vmatmul.mubr.bf16.vlgmr.msra.gmra.mrb[0].mxu0 %v235_v9  ;;  %1161 = vmatmul.mubr.bf16.vlgmr.msra.gmra.mrb[0].mxu1 %v235_v9 }
 0x1a9   : > { %v1080_v10 = vpop.f32.mrb[0].mxu0  ;;  %v1162_v11 = vpop.f32.mrb[0].mxu1 }
 0x1aa   : > { %v1082_v12 = vpop.f32.mrb[1].mxu0  ;;  %v1164_v13 = vpop.f32.mrb[1].mxu1 }
 0x1ab   : > { %v1169_v14 = vadd.f32 %v1082_v12, %v1080_v10  ;;  %v1084_v15 = vpop.f32.mrb[2].mxu0  ;;  %v1166_v16 = vpop.f32.mrb[2].mxu1 }
 0x1ac   : > { %v1085_v17 = vpop.f32.mrb[3].mxu0  ;;  %v1167_v18 = vpop.f32.mrb[3].mxu1 }
 0x1ad   : > { %v1170_v19 = vadd.f32 %v1169_v14, %v1162_v11 }
 0x1af   : > { %v1171_v20 = vadd.f32 %v1170_v19, %v1164_v13 }
 0x1b1   : > { %1172 = vadd.xlane.f32.xlu0 %v1171_v20 }
 0x23e   : > { %v1173_v21 = vpop.xlane.xlu0 %1172 }
 0x23f   : > { %v1174_v22 = vmul.f32 0.001953125, %v1173_v21 }
 0x241   : > { %v1175_v23 = vsub.f32 %v1080_v10, %v1174_v22  ;;  %v1176_v24 = vsub.f32 %v1082_v12, %v1174_v22  ;;  %v1177_v25 = vsub.f32 %v1162_v11, %v1174_v22  ;;  %v1178_v26 = vsub.f32 %v1164_v13, %v1174_v22 }
 0x243   : > { %v1179_v27 = vmul.f32 %v1175_v23, %v1175_v23  ;;  %v1180_v28 = vmul.f32 %v1176_v24, %v1176_v24  ;;  %v1181_v29 = vmul.f32 %v1177_v25, %v1177_v25  ;;  %v1182_v32 = vmul.f32 %v1178_v26, %v1178_v26 }
 0x245   : > { %v1183_v31 = vadd.f32 %v1180_v28, %v1179_v27 }
 0x247   : > { %v1184_v33 = vadd.f32 %v1183_v31, %v1181_v29 }
 0x249   : > { %v1185_v34 = vadd.f32 %v1184_v33, %v1182_v32 }
 0x24b   : > { %1186 = vadd.xlane.f32.xlu0 %v1185_v34 }
 0x2d8   : > { %v1187_v35 = vpop.xlane.xlu0 %1186 }
 0x2d9   : > { %v1188_v36 = vmul.f32 0.001953125, %v1187_v35 }
 0x2db   : > { %v1189_v38 = vadd.f32 1e-12, %v1188_v36 }
 0x2dd   : > { %1755 = vrsqrt.f32 %v1189_v38 }
 0x2e7   : > { %v1756_v51 = vpop.eup %1755 }
 0x2e8   : > { %v1191_v56 = vmul.f32 %v1756_v51, %v1175_v23  ;;  %v1192_v57 = vmul.f32 %v1756_v51, %v1176_v24  ;;  %v1193_v58 = vmul.f32 %v1756_v51, %v1177_v25  ;;  %v1194_v59 = vmul.f32 %v1756_v51, %v1178_v26 }
 0x2ea   : > { %v1217_v60 = vmul.f32 %v1200_v47, %v1191_v56  ;;  %v1218_v61 = vmul.f32 %v1204_v48, %v1192_v57  ;;  %v1219_v62 = vmul.f32 %v1208_v49, %v1193_v58  ;;  %v1220_v63 = vmul.f32 %v1212_v50, %v1194_v59 }
 0x2ec   : > { %v1243_v0 = vadd.f32 %v1226_v52, %v1217_v60  ;;  %v1244_v1 = vadd.f32 %v1230_v53, %v1218_v61  ;;  %v1245_v3 = vadd.f32 %v1234_v54, %v1219_v62  ;;  %v1246_v4 = vadd.f32 %v1238_v55, %v1220_v63 }
 0x2ee   : > { %v1247_v5 = vadd.f32 %v1243_v0, %v2075_v2  ;;  %v1248_v6 = vadd.f32 %v1244_v1, %v2070_v46  ;;  %v1249_v7 = vadd.f32 %v1245_v3, %v2085_v8  ;;  %v1250_v9 = vadd.f32 %v1246_v4, %v2080_v30 }
 0x2f0   : > { %1251 = vst [vmem:[%s228_s10] sm:$0xff] %v1247_v5  ;;  %1252 = vst [vmem:[%s228_s10 + $0x8] sm:$0xff] %v1248_v6 }
 0x2f1   : > { %1253 = vst [vmem:[%s228_s10 + $0x10] sm:$0xff] %v1249_v7  ;;  %1254 = vst [vmem:[%s228_s10 + $0x18] sm:$0xff] %v1250_v9 }
 0x2f2   : > { %1828 = shalt.err (!%p1825_p7)
}
 0x2f3   : > { %s1829_s25 = scalar_lea.hbm %s2105_s19, 512  ;;  %s1833_s21 = scalar_lea.hbm %s2153_s4, 1024 }
 0x2f4   : > { %p1830_p9 = scmp.ne.s32.totalorder %s2105_s19, %s1829_s25  ;;  %p1834_p0 = scmp.lt.u32.totalorder %s2105_s19, %s2153_s4 }
 0x2f5   : > { %p1835_p11 = scmp.lt.u32.totalorder %s1833_s21, %s1829_s25  ;;  %p1837_p4 = scmp.lt.u32.totalorder %s1829_s25, %s2105_s19 }
 0x2f6   : > { %p1831_p2 = pnand %p1830_p9, %p2008_p12 }
 0x2f7   : > { %p1836_p1 = por %p1835_p11, %p1834_p0 }
 0x2f8   : > { %p1832_p5 = pneg %p1831_p2 }
 0x2f9   : > { %p1838_p6 = por %p1837_p4, %p1836_p1 }
 0x2fb   : > { %p1839_p8 = pnand %p1838_p6, %p1832_p5 }
 0x2fd   : > { %1842 = shalt.err (!%p1839_p8)
}
 0x2fe   : > { %1510 = dma.vmem_to_hbm [thread:$0]  (%p2008_p12), %s2107_s14, 512, %s2105_s19, %s1256_s5  }
 0x2ff PF: > { %s1282_s28 = sand.u32 1, %s1873_s15   ;;  %p2168_p10 = scmp.ne.s32.totalorder %s2158_s22, 0 }
 0x300   : > { %p2169_p13 = scmp.ge.s32.totalorder %s1885_s18, 2  ;;  %s1283_s29 = scalar_lea.sflag [#allocation4], %s1282_s28 }
 0x302   : > { %p1521_p3 = pnand %p2169_p13, %p2168_p10 }
 0x304   : > { %1868 = dma.done.wait (!%p1521_p3), %s1283_s29, 512  }
 0x305   : > { %1870 = vsyncadd (!%p1521_p3), %s1283_s29, 4294966784  ;;  %p18_p7 = scmp.ge.s32.totalorder %s1973_s27, 4   ;;  %s2170_s15 = smov %s1877_s16 }
 0x306   : > { %s2171_s16 = smov %s1881_s17  ;;  %s2172_s17 = smov %s2004_s24 }
 0x307   : > { %s2173_s18 = smov %s1973_s27  ;;  %20 = sbr.rel (!%p18_p7) target bundleno = 6 (0x6), region = 85 }
 0x30e   :  { %1288 = vsyncpa [#allocation3], 1 }
 0x30f   :  { %1290 = vsyncpa [#allocation3 + $0x1], 1 }
 0x310   :  { %1291 = vsyncpa [#allocation6], 1 }
 0x311   :  { %1292 = vsyncpa [#allocation4], 1 }
 0x312   :  { %1294 = vsyncpa [#allocation4 + $0x1], 1 }

</bundles_post_ra>
